<compile_context>
chip_gen: v6e
topology: v6e:2x2x1
jax: 0.10.0
libtpu: 0.0.40
codegen_flags: <defaults>
</compile_context>

<pallas_src>
import functools
import math

import jax
import jax.numpy as jnp
from jax.experimental import pallas as pl
from jax.experimental.pallas import tpu as pltpu


def _round_up(x, m):
    return ((x + m - 1) // m) * m


def _gen_params():
    """Per-TPU-generation (per-input tile bytes, vmem_limit_bytes)."""
    kind = ""
    try:
        kind = jax.devices()[0].device_kind.lower()
    except Exception:
        pass
    if "v7" in kind or "7x" in kind:
        # v7x: ~3.2 TB/s HBM but only 64 MiB VMEM -> 8 MiB per input tile;
        # 2 inputs x 2 buffers x 8 MiB = 32 MiB live + small temporaries.
        return 8 * 1024 * 1024, 48 * 1024 * 1024
    if "v6" in kind:
        # v6e: 128 MiB physical VMEM (32 MiB default scoped) -> 4 MiB tiles.
        return 4 * 1024 * 1024, 64 * 1024 * 1024
    # v5e / unknown: stay inside the 16 MiB default scoped VMEM.
    return 2 * 1024 * 1024, None


def _vae_loss_kernel(recons_ref, input_ref, mu_ref, logvar_ref,
                     sse_ref, kld_ref, acc_ref, *,
                     steps_per_split, tile_rows, strip_rows, lanes,
                     valid_rows, needs_mask, inv_batch):
    i = pl.program_id(1)

    @pl.when(i == 0)
    def _init():
        acc_ref[...] = jnp.zeros_like(acc_ref)

    # Intended (unclamped) first row of this tile; drives the validity mask.
    row0 = (pl.program_id(0) * steps_per_split + i) * tile_rows

    def _accum(off):
        r = recons_ref[pl.ds(off, strip_rows), :].astype(jnp.float32)
        x = input_ref[pl.ds(off, strip_rows), :].astype(jnp.float32)
        d = r - x
        sq = d * d
        if needs_mask:
            rid = row0 + off + jax.lax.broadcasted_iota(
                jnp.int32, (strip_rows, lanes), 0)
            sq = jnp.where(rid < valid_rows, sq, 0.0)
        # Fold strip rows onto the 8-sublane accumulator (pure VPU adds).
        acc_ref[...] += jnp.sum(sq.reshape(strip_rows // 8, 8, lanes), axis=0)

    n_strips = tile_rows // strip_rows
    if n_strips == 1:
        _accum(0)
    else:
        def _body(s, carry):
            _accum(pl.multiple_of(s * strip_rows, strip_rows))
            return carry
        jax.lax.fori_loop(0, n_strips, _body, 0)

    @pl.when(i == pl.num_programs(1) - 1)
    def _finalize():
        # Per-core partial sum of squared errors (one cross-lane reduce).
        sse_ref[0, 0] = jnp.sum(acc_ref[...])
        # KLD term is tiny (B x latent); computed identically on every core,
        # the wrapper reads row 0 only.
        mu = mu_ref[...].astype(jnp.float32)
        lv = logvar_ref[...].astype(jnp.float32)
        per_sample = jnp.sum(1.0 + lv - mu * mu - jnp.exp(lv),
                             axis=1, keepdims=True)          # (B, 1)
        kld_ref[0, 0] = -0.5 * jnp.sum(per_sample) * inv_batch


def vae_loss(recons, inputs, mu, log_var, *, kld_weight=0.00025,
             _max_tile_rows=None, _max_strip_rows=None):
    assert recons.shape == inputs.shape
    B, latent_dim = mu.shape
    total_elems = math.prod(recons.shape)

    # ---- lane-dense 2-D view, avoiding any pad copy whenever possible ------
    lanes = None
    for cand in (512, 256, 128):
        if total_elems % (cand * 8) == 0:
            lanes = cand
            break
    if lanes is None:
        # TODO(synk): rare shapes (total not a multiple of 1024) still take a
        # zero-pad copy; an in-kernel flat-index mask would remove it too.
        lanes = 128
        padded_total = _round_up(total_elems, lanes * 8)
    else:
        padded_total = total_elems
    rows = padded_total // lanes                               # multiple of 8

    def _prep(x):
        flat = x.reshape(-1)                                   # native dtype
        if padded_total != total_elems:
            flat = jnp.pad(flat, (0, padded_total - total_elems))
        return flat.reshape(rows, lanes)

    recons2d = _prep(recons)
    inputs2d = _prep(inputs)

    # ---- generation-specific tiling -----------------------------------------
    itemsize = max(recons.dtype.itemsize, inputs.dtype.itemsize)
    target_tile_bytes, vmem_limit = _gen_params()
    tile_rows = max(8, (target_tile_bytes // (lanes * itemsize)) // 8 * 8)
    if _max_tile_rows is not None:
        tile_rows = min(tile_rows, max(8, (_max_tile_rows // 8) * 8))
    tile_rows = min(tile_rows, rows)

    strip_rows = 8
    for cand in (256, 128, 64, 32, 16, 8):
        if tile_rows % cand == 0:
            strip_rows = cand
            break
    if _max_strip_rows is not None:
        strip_rows = min(strip_rows, max(8, (_max_strip_rows // 8) * 8))
        while tile_rows % strip_rows != 0:
            strip_rows -= 8

    n_blocks = (rows + tile_rows - 1) // tile_rows
    splits = 2 if n_blocks >= 2 else 1           # v7x: one half per TensorCore
    steps_per_split = (n_blocks + splits - 1) // splits
    needs_mask = splits * steps_per_split * tile_rows != rows
    overshoot = splits * steps_per_split > n_blocks

    def img_map(c, i):
        blk = c * steps_per_split + i
        if overshoot:  # keep the DMA in-bounds; the row mask discards extras
            blk = jnp.minimum(blk, n_blocks - 1)
        return (blk, 0)

    kernel = functools.partial(
        _vae_loss_kernel,
        steps_per_split=steps_per_split, tile_rows=tile_rows,
        strip_rows=strip_rows, lanes=lanes, valid_rows=rows,
        needs_mask=needs_mask, inv_batch=1.0 / float(B))

    part_shape = jax.ShapeDtypeStruct((splits, 1), jnp.float32)
    part_spec = pl.BlockSpec((1, 1), lambda c, i: (c, 0),
                             memory_space=pltpu.MemorySpace.SMEM)

    sse_parts, kld_parts = pl.pallas_call(
        kernel,
        grid=(splits, steps_per_split),
        out_shape=(part_shape, part_shape),
        in_specs=[
            pl.BlockSpec((tile_rows, lanes), img_map),
            pl.BlockSpec((tile_rows, lanes), img_map),
            pl.BlockSpec((B, latent_dim), lambda c, i: (0, 0)),
            pl.BlockSpec((B, latent_dim), lambda c, i: (0, 0)),
        ],
        out_specs=(part_spec, part_spec),
        scratch_shapes=[pltpu.VMEM((8, lanes), jnp.float32)],
        compiler_params=pltpu.CompilerParams(
            dimension_semantics=("parallel", "arbitrary"),
            vmem_limit_bytes=vmem_limit),
    )(recons2d, inputs2d, mu, log_var)

    # Tiny scalar epilogue: combine per-core partials + apply the scalings.
    recons_loss = jnp.sum(sse_parts) * (1.0 / float(total_elems))
    kld_loss = kld_parts[0, 0]
    loss = recons_loss + kld_weight * kld_loss
    return {"loss": loss, "recons_loss": recons_loss, "kld_loss": kld_loss}


def _reference(recons, inputs, mu, log_var, kld_weight=0.00025):
    recons_loss = jnp.mean((recons - inputs) ** 2)
    kld_loss = jnp.mean(
        -0.5 * jnp.sum(1.0 + log_var - mu**2 - jnp.exp(log_var), axis=1),
        axis=0)
    loss = recons_loss + kld_weight * kld_loss
    return {"loss": loss, "recons_loss": recons_loss, "kld_loss": kld_loss}


if __name__ == "__main__":
    key = jax.random.PRNGKey(0)
    k1, k2, k3, k4 = jax.random.split(key, 4)

    B, C, H, W = 2, 4, 16, 16
    latent_dim = 32

    recons = jax.random.normal(k1, (B, C, H, W), dtype=jnp.float32)
    inputs = jax.random.normal(k2, (B, C, H, W), dtype=jnp.float32)
    mu = jax.random.normal(k3, (B, latent_dim), dtype=jnp.float32)
    log_var = 0.1 * jax.random.normal(k4, (B, latent_dim), dtype=jnp.float32)

    out = vae_loss(recons, inputs, mu, log_var, kld_weight=0.00025)
    out = jax.tree_util.tree_map(jax.block_until_ready, out)
    ref = _reference(recons, inputs, mu, log_var, 0.00025)
    for k in ("loss", "recons_loss", "kld_loss"):
        assert jnp.allclose(out[k], ref[k], rtol=1e-5, atol=1e-5), (
            k, out[k], ref[k])

    # Secondary check (still tiny): forces multi-tile grid, the 2-way core
    # split, last-tile row masking and the strip-mined accumulation loop.
    B2, C2, H2, W2 = 2, 4, 24, 16
    r2 = jax.random.normal(k1, (B2, C2, H2, W2), dtype=jnp.float32)
    x2 = jax.random.normal(k2, (B2, C2, H2, W2), dtype=jnp.float32)
    out2 = vae_loss(r2, x2, mu, log_var, kld_weight=0.00025,
                    _max_tile_rows=16, _max_strip_rows=8)
    out2 = jax.tree_util.tree_map(jax.block_until_ready, out2)
    ref2 = _reference(r2, x2, mu, log_var, 0.00025)
    for k in ("loss", "recons_loss", "kld_loss"):
        assert jnp.allclose(out2[k], ref2[k], rtol=1e-5, atol=1e-5), (
            k, out2[k], ref2[k])

    print("KERNEL_OK")
</pallas_src>

<mosaic_0001>
module attributes {stable_mosaic.version = 11 : i64} {
  func.func @_vae_loss_kernel(%arg0: i32, %arg1: i32, %arg2: memref<8x256xf32, #tpu.memory_space<vmem>>, %arg3: memref<8x256xf32, #tpu.memory_space<vmem>>, %arg4: memref<2x32xf32, #tpu.memory_space<vmem>>, %arg5: memref<2x32xf32, #tpu.memory_space<vmem>>, %arg6: memref<1x1xf32, #tpu.memory_space<smem>>, %arg7: memref<1x1xf32, #tpu.memory_space<smem>>, %arg8: memref<8x256xf32, #tpu.memory_space<vmem>>) attributes {dimension_semantics = [#tpu.dimension_semantics<parallel>, #tpu.dimension_semantics<arbitrary>], iteration_bounds = array<i64: 1, 1>, scalar_prefetch = 0 : i64, scratch_operands = 1 : i64, tpu.core_type = #tpu.core_type<tc>, window_params = [{transform_indices = @transform_0, window_bounds = array<i64: 8, 256>}, {transform_indices = @transform_1, window_bounds = array<i64: 8, 256>}, {pipeline_mode = #tpu.pipeline_mode<synchronous>, transform_indices = @transform_2, window_bounds = array<i64: 2, 32>}, {pipeline_mode = #tpu.pipeline_mode<synchronous>, transform_indices = @transform_3, window_bounds = array<i64: 2, 32>}, {transform_indices = @transform_4, window_bounds = array<i64: 1, 1>}, {transform_indices = @transform_5, window_bounds = array<i64: 1, 1>}]} {
    %c0_i32 = arith.constant 0 : i32
    %0 = arith.cmpi eq, %arg1, %c0_i32 : i32
    %1 = arith.extui %0 : i1 to i32
    %c0_i32_0 = arith.constant 0 : i32
    %2 = arith.cmpi ne, %1, %c0_i32_0 : i32
    scf.if %2 {
      %cst_10 = arith.constant 0.000000e+00 : f32
      %15 = vector.broadcast %cst_10 : f32 to vector<8x256xf32>
      %c0_11 = arith.constant 0 : index
      %c0_12 = arith.constant 0 : index
      %16 = vector.load %arg8[%c0_11, %c0_12] : memref<8x256xf32, #tpu.memory_space<vmem>>, vector<8x256xf32>
      tpu.vector_store %arg8[%c0_11, %c0_12], %15 {strides = array<i32>} : memref<8x256xf32, #tpu.memory_space<vmem>>, vector<8x256xf32>,
    } else {
    }
    %c0 = arith.constant 0 : index
    %c0_1 = arith.constant 0 : index
    %3 = vector.load %arg2[%c0, %c0_1] : memref<8x256xf32, #tpu.memory_space<vmem>>, vector<8x256xf32>
    %c0_2 = arith.constant 0 : index
    %c0_3 = arith.constant 0 : index
    %4 = vector.load %arg3[%c0_2, %c0_3] : memref<8x256xf32, #tpu.memory_space<vmem>>, vector<8x256xf32>
    %5 = arith.subf %3, %4 : vector<8x256xf32>
    %6 = arith.mulf %5, %5 : vector<8x256xf32>
    %c0_4 = arith.constant 0 : index
    %c0_5 = arith.constant 0 : index
    %7 = vector.load %arg8[%c0_4, %c0_5] : memref<8x256xf32, #tpu.memory_space<vmem>>, vector<8x256xf32>
    %8 = vector.shape_cast %6 : vector<8x256xf32> to vector<1x8x256xf32>
    %cst = arith.constant dense<0.000000e+00> : vector<8x256xf32>
    %9 = vector.multi_reduction <add>, %8, %cst [0] : vector<1x8x256xf32> to vector<8x256xf32>
    %10 = arith.addf %7, %9 : vector<8x256xf32>
    %c0_6 = arith.constant 0 : index
    %c0_7 = arith.constant 0 : index
    %11 = vector.load %arg8[%c0_6, %c0_7] : memref<8x256xf32, #tpu.memory_space<vmem>>, vector<8x256xf32>
    tpu.vector_store %arg8[%c0_6, %c0_7], %10 {strides = array<i32>} : memref<8x256xf32, #tpu.memory_space<vmem>>, vector<8x256xf32>,
    %c0_i32_8 = arith.constant 0 : i32
    %12 = arith.cmpi eq, %arg1, %c0_i32_8 : i32
    %13 = arith.extui %12 : i1 to i32
    %c0_i32_9 = arith.constant 0 : i32
    %14 = arith.cmpi ne, %13, %c0_i32_9 : i32
    scf.if %14 {
      %c0_10 = arith.constant 0 : index
      %c0_11 = arith.constant 0 : index
      %15 = vector.load %arg8[%c0_10, %c0_11] : memref<8x256xf32, #tpu.memory_space<vmem>>, vector<8x256xf32>
      %16 = vector.shape_cast %15 : vector<8x256xf32> to vector<1x8x256xf32>
      %cst_12 = arith.constant dense<0.000000e+00> : vector<1xf32>
      %17 = vector.multi_reduction <add>, %16, %cst_12 [1, 2] : vector<1x8x256xf32> to vector<1xf32>
      %18 = vector.shape_cast %17 : vector<1xf32> to vector<1x1x1xf32>
      %19 = vector.extract %18[0, 0, 0] : f32 from vector<1x1x1xf32>
      %c0_13 = arith.constant 0 : index
      %c0_14 = arith.constant 0 : index
      %20 = memref.load %arg6[%c0_13, %c0_14] : memref<1x1xf32, #tpu.memory_space<smem>>
      memref.store %19, %arg6[%c0_13, %c0_14] : memref<1x1xf32, #tpu.memory_space<smem>>
      %c0_15 = arith.constant 0 : index
      %c0_16 = arith.constant 0 : index
      %21 = vector.load %arg4[%c0_15, %c0_16] : memref<2x32xf32, #tpu.memory_space<vmem>>, vector<2x32xf32>
      %c0_17 = arith.constant 0 : index
      %c0_18 = arith.constant 0 : index
      %22 = vector.load %arg5[%c0_17, %c0_18] : memref<2x32xf32, #tpu.memory_space<vmem>>, vector<2x32xf32>
      %cst_19 = arith.constant 1.000000e+00 : f32
      %23 = vector.broadcast %cst_19 : f32 to vector<2x32xf32>
      %24 = arith.addf %23, %22 : vector<2x32xf32>
      %25 = arith.mulf %21, %21 : vector<2x32xf32>
      %26 = arith.subf %24, %25 : vector<2x32xf32>
      %27 = math.exp %22 : vector<2x32xf32>
      %28 = arith.subf %26, %27 : vector<2x32xf32>
      %cst_20 = arith.constant dense<0.000000e+00> : vector<2xf32>
      %29 = vector.multi_reduction <add>, %28, %cst_20 [1] : vector<2x32xf32> to vector<2xf32>
      %30 = vector.shape_cast %29 : vector<2xf32> to vector<2x1xf32>
      %31 = vector.shape_cast %30 : vector<2x1xf32> to vector<1x2x1xf32>
      %cst_21 = arith.constant dense<0.000000e+00> : vector<1xf32>
      %32 = vector.multi_reduction <add>, %31, %cst_21 [1, 2] : vector<1x2x1xf32> to vector<1xf32>
      %33 = vector.shape_cast %32 : vector<1xf32> to vector<1x1x1xf32>
      %34 = vector.extract %33[0, 0, 0] : f32 from vector<1x1x1xf32>
      %cst_22 = arith.constant -5.000000e-01 : f32
      %35 = arith.mulf %cst_22, %34 : f32
      %cst_23 = arith.constant 5.000000e-01 : f32
      %36 = arith.mulf %35, %cst_23 : f32
      %c0_24 = arith.constant 0 : index
      %c0_25 = arith.constant 0 : index
      %37 = memref.load %arg7[%c0_24, %c0_25] : memref<1x1xf32, #tpu.memory_space<smem>>
      memref.store %36, %arg7[%c0_24, %c0_25] : memref<1x1xf32, #tpu.memory_space<smem>>
    } else {
    }
    return
  }
  func.func @transform_0(%arg0: i32, %arg1: i32) -> (i32, i32) {
    %c1_i32 = arith.constant 1 : i32
    %0 = arith.muli %arg0, %c1_i32 : i32
    %1 = arith.addi %0, %arg1 : i32
    %c0_i32 = arith.constant 0 : i32
    %c0_i32_0 = arith.constant 0 : i32
    return %1, %c0_i32 : i32, i32
  }
  func.func @transform_1(%arg0: i32, %arg1: i32) -> (i32, i32) {
    %c1_i32 = arith.constant 1 : i32
    %0 = arith.muli %arg0, %c1_i32 : i32
    %1 = arith.addi %0, %arg1 : i32
    %c0_i32 = arith.constant 0 : i32
    %c0_i32_0 = arith.constant 0 : i32
    return %1, %c0_i32 : i32, i32
  }
  func.func @transform_2(%arg0: i32, %arg1: i32) -> (i32, i32) {
    %c0_i32 = arith.constant 0 : i32
    %c0_i32_0 = arith.constant 0 : i32
    %c0_i32_1 = arith.constant 0 : i32
    return %c0_i32, %c0_i32_0 : i32, i32
  }
  func.func @transform_3(%arg0: i32, %arg1: i32) -> (i32, i32) {
    %c0_i32 = arith.constant 0 : i32
    %c0_i32_0 = arith.constant 0 : i32
    %c0_i32_1 = arith.constant 0 : i32
    return %c0_i32, %c0_i32_0 : i32, i32
  }
  func.func @transform_4(%arg0: i32, %arg1: i32) -> (i32, i32) {
    %c0_i32 = arith.constant 0 : i32
    %c0_i32_0 = arith.constant 0 : i32
    return %arg0, %c0_i32 : i32, i32
  }
  func.func @transform_5(%arg0: i32, %arg1: i32) -> (i32, i32) {
    %c0_i32 = arith.constant 0 : i32
    %c0_i32_0 = arith.constant 0 : i32
    return %arg0, %c0_i32 : i32, i32
  }
}

</mosaic_0001>

<bundles_post_ra>
// kernel: tpu_custom_call.1
= control target key start
LH: loop header
LB: loop body
LE: loop exit
PB: predicated region body
PF: predicated region fallthrough
CT: control target
= control target key end

     0   :  { %11 = vsyncpa [#allocation4], 0  ;;  %s274_s0 = inlined_call_operand.hbm [shape: f32[8,256], index: 0, kind: input, shape index: {}]   ;;  %s275_s1 = inlined_call_operand.hbm [shape: f32[8,256], index: 1, kind: input, shape index: {}]   ;;  %s276_s2 = inlined_call_operand.vmem [shape: f32[2,32], index: 2, kind: input, shape index: {}]   ;;  %s277_s3 = inlined_call_operand.vmem [shape: f32[2,32], index: 3, kind: input, shape index: {}]   ;;  %s278_s4 = inlined_call_operand.hbm [shape: f32[1,1], index: 4, kind: output, shape index: {0}]   ;;  %s279_s5 = inlined_call_operand.hbm [shape: f32[1,1], index: 5, kind: output, shape index: {1}]  }
   0x1   :  { %12 = vsyncpa [#allocation7], 0 }
   0x2   :  { %13 = vsyncpa [#allocation5], 0 }
   0x3   :  { %14 = vsyncpa [#allocation10], 0  ;;  %s222_s18 = smov [#allocation3]   ;;  %s223_s20 = smov [#allocation6]  }
   0x4   :  { %s25_s19 = sshll.u32 %s222_s18, 4  ;;  %s39_s21 = sshll.u32 %s223_s20, 4  ;;  %s26_s19 = int_to_ptr.vmem [resolvable:$true] %s25_s19  ;;  %s40_s21 = int_to_ptr.vmem [resolvable:$true] %s39_s21 }
   0x5   :  { %s166_s22 = scalar_lea.vmem %s26_s19, 256  ;;  %p171_p1 = scmp.lt.s32.totalorder %s26_s19, %s26_s19 }
   0x6   :  { %p167_p0 = scmp.ne.s32.totalorder %s26_s19, %s166_s22  ;;  %p172_p2 = scmp.lt.s32.totalorder %s166_s22, %s166_s22 }
   0x8   :  { %p173_p3 = por %p172_p2, %p171_p1 }
   0xa   :  { %p174_p4 = pnand %p173_p3, %p167_p0 }
   0xc   :  { %177 = shalt.err (!%p174_p4)
}
   0xd   :  { %28 = dma.hbm_to_vmem [thread:$0]  %s274_s0, 256, %s26_s19, [#allocation4]  }
   0xe   :  { %s186_s25 = scalar_lea.vmem %s40_s21, 256  ;;  %p191_p6 = scmp.lt.s32.totalorder %s40_s21, %s40_s21 }
   0xf   :  { %p187_p5 = scmp.ne.s32.totalorder %s40_s21, %s186_s25  ;;  %p192_p7 = scmp.lt.s32.totalorder %s186_s25, %s186_s25 }
  0x11   :  { %p193_p8 = por %p192_p7, %p191_p6 }
  0x13   :  { %p194_p9 = pnand %p193_p8, %p187_p5 }
  0x15   :  { %197 = shalt.err (!%p194_p9)
}
  0x16   :  { %42 = dma.hbm_to_vmem [thread:$0]  %s275_s1, 256, %s40_s21, [#allocation7]  }
  0x17   :  { %214 = dma.done.wait [#allocation4], 256  }
  0x18   :  { %215 = vsyncadd [#allocation4], 4294967040 }
  0x19   :  { %216 = dma.done.wait [#allocation7], 256  }
  0x1a   :  { %217 = vsyncadd [#allocation7], 4294967040  ;;  %v95_v0 = vld [vmem:[%s277_s3] sm:$0x3]  ;;  %v62_v6 = vld [vmem:[#allocation3 + $0x8] sm:$0xff]  ;;  %vm102_vm0 = vcmask 254976  }
  0x1b   :  { %v99_v1 = vmul.f32 1.442695, %v95_v0  ;;  %v94_v2 = vld [vmem:[%s276_s2] sm:$0x3]  ;;  %v96_v4 = vadd.f32 1.0, %v95_v0  ;;  %v63_v7 = vld [vmem:[#allocation6] sm:$0xff] }
  0x1c   :  { %v61_v3 = vld [vmem:[#allocation3] sm:$0xff]  ;;  %v97_v5 = vmul.f32 %v94_v2, %v94_v2  ;;  %v64_v8 = vld [vmem:[#allocation6 + $0x8] sm:$0xff]  ;;  %vm106_vm1 = vcmask 1024   ;;  %s224_s2 = smov [#allocation8]   ;;  %s225_s10 = smov [#allocation9]  }
  0x1d   :  { %156 = vpow2.f32 %v99_v1  ;;  %v65_v9 = vsub.f32 %v61_v3, %v63_v7  ;;  %v66_v10 = vsub.f32 %v62_v6, %v64_v8 }
  0x1e   :  { %v98_v11 = vsub.f32 %v96_v4, %v97_v5 }
  0x1f   :  { %v67_v13 = vmul.f32 %v65_v9, %v65_v9  ;;  %v68_v14 = vmul.f32 %v66_v10, %v66_v10 }
  0x21   :  { %v82_v17 = vadd.f32 %v68_v14, %v67_v13 }
  0x2a   :  { %v157_v12 = vpop.eup %156 }
  0x2b   :  { %v101_v15 = vsub.f32 %v98_v11, %v157_v12 }
  0x2d   :  { %v103_v16 = vsel %vm102_vm0, %v101_v15, 0.0 }
  0x2e   :  { %104 = vadd.xlane.f32.xlu0 %v103_v16 }
  0x32   :  { %83 = vadd.xlane.f32.xlu0 %v82_v17 }
  0xb7   :  { %v105_v18 = vpop.xlane.xlu0 %104 }
  0xb8   :  { %v107_v19 = vsel %vm106_vm1, %v105_v18, 0.0 }
  0xb9   :  { %108 = vadd.xlane.f32.xlu1 %v107_v19 }
  0xbb   :  { %v84_v20 = vpop.xlane.xlu0 %83 }
  0xbc   :  { %v85_v21 = vrot.slane %v84_v20, 4 }
  0xbe   :  { %v86_v22 = vadd.f32 %v85_v21, %v84_v20 }
  0xc0   :  { %v87_v23 = vrot.slane %v86_v22, 2 }
  0xc2   :  { %v88_v24 = vadd.f32 %v87_v23, %v86_v22 }
  0xc4   :  { %v89_v25 = vrot.slane %v88_v24, 1 }
  0xc6   :  { %v90_v26 = vadd.f32 %v89_v25, %v88_v24 }
  0xc8   :  { %148 = vpush %v90_v26 }
  0xf9   :  { %s149_s1 = spop %148 }
  0xfa   :  { %93 = sst [smem:[#allocation8]] %s149_s1 }
  0xfb   :  { %128 = dma.smem_to_hbm %s224_s2, 16, %s278_s4, [#allocation5]  }
 0x142   :  { %v109_v27 = vpop.xlane.xlu1 %108 }
 0x143   :  { %v110_v28 = vrot.slane %v109_v27, 4 }
 0x145   :  { %v111_v29 = vadd.f32 %v110_v28, %v109_v27 }
 0x147   :  { %v112_v30 = vrot.slane %v111_v29, 2 }
 0x149   :  { %v113_v31 = vadd.f32 %v112_v30, %v111_v29 }
 0x14b   :  { %v114_v32 = vrot.slane %v113_v31, 1 }
 0x14d   :  { %v115_v33 = vadd.f32 %v114_v32, %v113_v31 }
 0x14f   :  { %150 = vpush %v115_v33 }
 0x180   :  { %s151_s7 = spop %150 }
 0x181   :  { %s117_s8 = smul.f32 -0.5, %s151_s7 }
 0x183   :  { %s118_s9 = smul.f32 0.5, %s117_s8 }
 0x185   :  { %120 = sst [smem:[#allocation9]] %s118_s9 }
 0x186   :  { %136 = dma.smem_to_hbm %s225_s10, 16, %s279_s5, [#allocation10]  }
 0x187   :  { %218 = dma.done.wait [#allocation5], 16  }
 0x188   :  { %219 = vsyncadd [#allocation5], 4294967280 }
 0x189   :  { %220 = dma.done.wait [#allocation10], 16  }
 0x18a   :  { %221 = vsyncadd [#allocation10], 4294967280 }
 0x18b   :  { %143 = sfence }
 0x18c   :  { %144 = vsyncpa [#allocation4], 1 }
 0x18d   :  { %145 = vsyncpa [#allocation7], 1 }
 0x18e   :  { %146 = vsyncpa [#allocation5], 1 }
 0x18f   :  { %147 = vsyncpa [#allocation10], 1 }

</bundles_post_ra>
